<compile_context>
chip_gen: v5e
topology: v5e:2x2
jax: 0.10.0
libtpu: 0.0.40
codegen_flags: <defaults>
</compile_context>

<pallas_src>
import functools

import jax
import jax.numpy as jnp
from jax.experimental import pallas as pl
from jax.experimental.pallas import tpu as pltpu

PAD_ID = 0  # token_to_id['<pad>']


def _dtp_loss_kernel(logits_ref, targets_ref, vals_ref, part_ref, *, pad_id):
    # ----- classification partials: masked cross entropy ---------------------
    logits = logits_ref[...].astype(jnp.float32)       # (TN, V), cast in-vreg
    targets = targets_ref[...]                         # (TN, 1) int32
    tn, v = logits.shape

    lane = jax.lax.broadcasted_iota(jnp.int32, (tn, v), 1)
    is_tgt = lane == targets                            # (TN, V) bool

    m = jnp.max(logits, axis=-1, keepdims=True)                               # (TN, 1)
    lse = m + jnp.log(jnp.sum(jnp.exp(logits - m), axis=-1, keepdims=True))   # (TN, 1)
    # select-reduce instead of materializing a one-hot f32 temporary
    tgt_logit = jnp.sum(jnp.where(is_tgt, logits, 0.0), axis=-1, keepdims=True)

    valid = (targets != pad_id).astype(jnp.float32)     # (TN, 1); padded rows -> 0
    ce_sum = jnp.sum((lse - tgt_logit) * valid)
    valid_cnt = jnp.sum(valid)

    # ----- regression partials: masked SSE (rides along with the tile) -------
    vals = vals_ref[...]                                # (3, TN) f32: [vp; vt; vm]
    diff = vals[0:1, :] - vals[1:2, :]
    vm = vals[2:3, :]
    sse = jnp.sum(vm * diff * diff)
    cnt = jnp.sum(vm)

    # ----- emit lane-dense per-tile partials ----------------------------------
    # row 0: ce_sum, row 1: valid_cnt, row 2: sse, row 3: mask_cnt (rest zero)
    row = jax.lax.broadcasted_iota(jnp.int32, (8, 128), 0)
    out = jnp.where(row == 0, ce_sum, 0.0)
    out = jnp.where(row == 1, valid_cnt, out)
    out = jnp.where(row == 2, sse, out)
    out = jnp.where(row == 3, cnt, out)
    part_ref[...] = out[None, :, :]


def dtp_loss_rb1(token_preds, token_targets, value_preds, value_targets,
                 value_mask, *, cls_weight=1.0, reg_weight=1.0, alpha=2.0,
                 pad_id=PAD_ID):
    """Functional equivalent of DTP_Loss_RB1.forward (one step of its stateful
    dynamic-task-prioritization update, from the deterministic init cw=rw=1)."""
    b, t, v = token_preds.shape
    n = b * t

    # ---- row-tile size: largest multiple of 128 keeping a logits tile <= 4 MiB
    itemsize = jnp.dtype(token_preds.dtype).itemsize
    tile_budget = 4 * 1024 * 1024
    tn = (tile_budget // max(v * itemsize, 1)) // 128 * 128
    tn = max(128, min(1024, tn))
    n_pad = pl.cdiv(n, 128) * 128
    tn = min(tn, n_pad)
    n_pad = pl.cdiv(n, tn) * tn
    num_tiles = n_pad // tn

    # ---- flatten + pad (padded rows have target == pad_id and mask == 0) -----
    logits = token_preds.reshape(n, v)                     # keep native dtype
    targets = token_targets.reshape(n).astype(jnp.int32)
    vp = value_preds.reshape(n).astype(jnp.float32)
    vt = value_targets.reshape(n).astype(jnp.float32)
    vm = value_mask.reshape(n).astype(jnp.float32)

    pad = n_pad - n
    if pad:
        logits = jnp.pad(logits, ((0, pad), (0, 0)))
        targets = jnp.pad(targets, (0, pad), constant_values=pad_id)
        vp = jnp.pad(vp, (0, pad))
        vt = jnp.pad(vt, (0, pad))
        vm = jnp.pad(vm, (0, pad))

    targets = targets.reshape(n_pad, 1)
    vals = jnp.stack([vp, vt, vm], axis=0)                 # (3, n_pad) lane-dense

    partials = pl.pallas_call(
        functools.partial(_dtp_loss_kernel, pad_id=pad_id),
        out_shape=jax.ShapeDtypeStruct((num_tiles, 8, 128), jnp.float32),
        grid=(num_tiles,),
        in_specs=[
            pl.BlockSpec((tn, v), lambda i: (i, 0)),       # logits (native dtype)
            pl.BlockSpec((tn, 1), lambda i: (i, 0)),       # targets
            pl.BlockSpec((3, tn), lambda i: (0, i)),       # packed [vp; vt; vm]
        ],
        out_specs=pl.BlockSpec((1, 8, 128), lambda i: (i, 0, 0)),
        compiler_params=pltpu.CompilerParams(
            dimension_semantics=("parallel",),             # independent tiles
            vmem_limit_bytes=32 * 1024 * 1024,
        ),
    )(logits, targets, vals)

    # ---- tiny final reduction in JAX ------------------------------------------
    p = partials[:, :, 0]                                  # (num_tiles, 8)
    ce_sum = jnp.sum(p[:, 0])
    valid_cnt = jnp.sum(p[:, 1])
    sse = jnp.sum(p[:, 2])
    cnt = jnp.sum(p[:, 3])

    # NaN if every target is <pad>, matching nn.CrossEntropyLoss behavior.
    cls_loss = ce_sum / valid_cnt
    reg_loss = jnp.where(cnt > 0.0, sse / jnp.maximum(cnt, 1.0), 0.0)

    # Dynamic task-prioritization weight update (host-side .item() branch in the
    # PyTorch code, expressed functionally here).
    # TODO(synk): the PyTorch module mutates its weights across calls; only a
    # single step from cw = rw = 1.0 is reproduced here.
    cond = cls_loss > reg_loss
    cw = jnp.where(cond, cls_weight * alpha, cls_weight)
    rw = jnp.where(cond, reg_weight, reg_weight * alpha)
    tot = jnp.maximum(cw, rw)
    cw = cw / tot
    rw = rw / tot

    combined = cw * cls_loss + rw * reg_loss
    return combined, cls_loss, reg_loss


if __name__ == "__main__":
    # Small shapes consistent with the module: batch=2, seq=8, vocab=32.
    B, T, V = 2, 8, 32
    key = jax.random.PRNGKey(0)
    k1, k2, k3, k4, k5 = jax.random.split(key, 5)

    token_preds = jax.random.normal(k1, (B, T, V), dtype=jnp.float32)
    token_targets = jax.random.randint(k2, (B, T), 0, V, dtype=jnp.int32)
    # make a couple of positions padding to exercise ignore_index
    token_targets = token_targets.at[0, -1].set(PAD_ID).at[1, -2].set(PAD_ID)
    value_preds = jax.random.normal(k3, (B, T), dtype=jnp.float32)
    value_targets = jax.random.normal(k4, (B, T), dtype=jnp.float32)
    value_mask = jax.random.bernoulli(k5, 0.6, (B, T))

    combined, cls_loss, reg_loss = jax.jit(dtp_loss_rb1)(
        token_preds, token_targets, value_preds, value_targets, value_mask)
    jax.block_until_ready((combined, cls_loss, reg_loss))

    # Pure-JAX reference check.
    logp = jax.nn.log_softmax(token_preds.reshape(-1, V), axis=-1)
    tgt = token_targets.reshape(-1)
    valid = tgt != PAD_ID
    ref_cls = -jnp.sum(jnp.where(valid, logp[jnp.arange(B * T), tgt], 0.0)) / jnp.sum(valid)
    vm = value_mask.reshape(-1)
    cnt = jnp.sum(vm)
    ref_reg = jnp.where(
        cnt > 0,
        jnp.sum(jnp.where(vm, (value_preds.reshape(-1) - value_targets.reshape(-1)) ** 2, 0.0))
        / jnp.maximum(cnt, 1),
        0.0)
    cond = ref_cls > ref_reg
    cw = jnp.where(cond, 2.0, 1.0)
    rw = jnp.where(cond, 1.0, 2.0)
    tot = jnp.maximum(cw, rw)
    ref_combined = (cw / tot) * ref_cls + (rw / tot) * ref_reg

    assert jnp.allclose(cls_loss, ref_cls, atol=1e-5, rtol=1e-5), (cls_loss, ref_cls)
    assert jnp.allclose(reg_loss, ref_reg, atol=1e-5, rtol=1e-5), (reg_loss, ref_reg)
    assert jnp.allclose(combined, ref_combined, atol=1e-5, rtol=1e-5), (combined, ref_combined)

    print("KERNEL_OK")
</pallas_src>

<mosaic_0001>
module attributes {stable_mosaic.version = 11 : i64} {
  func.func @_dtp_loss_kernel(%arg0: i32, %arg1: memref<128x32xf32, #tpu.memory_space<vmem>>, %arg2: memref<128x1xi32, #tpu.memory_space<vmem>>, %arg3: memref<3x128xf32, #tpu.memory_space<vmem>>, %arg4: memref<1x8x128xf32, #tpu.memory_space<vmem>>) attributes {dimension_semantics = [#tpu.dimension_semantics<parallel>], iteration_bounds = array<i64: 1>, scalar_prefetch = 0 : i64, scratch_operands = 0 : i64, tpu.core_type = #tpu.core_type<tc>, window_params = [{transform_indices = @transform_0, window_bounds = array<i64: 128, 32>}, {transform_indices = @transform_1, window_bounds = array<i64: 128, 1>}, {transform_indices = @transform_2, window_bounds = array<i64: 3, 128>}, {transform_indices = @transform_3, window_bounds = array<i64: 1, 8, 128>}]} {
    %c0 = arith.constant 0 : index
    %c0_0 = arith.constant 0 : index
    %0 = vector.load %arg1[%c0, %c0_0] : memref<128x32xf32, #tpu.memory_space<vmem>>, vector<128x32xf32>
    %c0_1 = arith.constant 0 : index
    %c0_2 = arith.constant 0 : index
    %1 = vector.load %arg2[%c0_1, %c0_2] : memref<128x1xi32, #tpu.memory_space<vmem>>, vector<128x1xi32>
    %2 = tpu.iota {dimensions = array<i32: 1>} : vector<128x32xi32>
    %3 = vector.broadcast %1 : vector<128x1xi32> to vector<128x32xi32>
    %4 = arith.cmpi eq, %2, %3 : vector<128x32xi32>
    %cst = arith.constant dense<0xFF800000> : vector<128xf32>
    %5 = vector.multi_reduction <maximumf>, %0, %cst [1] : vector<128x32xf32> to vector<128xf32>
    %6 = vector.shape_cast %5 : vector<128xf32> to vector<128x1xf32>
    %7 = vector.broadcast %6 : vector<128x1xf32> to vector<128x32xf32>
    %8 = arith.subf %0, %7 : vector<128x32xf32>
    %9 = math.exp %8 : vector<128x32xf32>
    %cst_3 = arith.constant dense<0.000000e+00> : vector<128xf32>
    %10 = vector.multi_reduction <add>, %9, %cst_3 [1] : vector<128x32xf32> to vector<128xf32>
    %11 = vector.shape_cast %10 : vector<128xf32> to vector<128x1xf32>
    %12 = math.log %11 : vector<128x1xf32>
    %13 = arith.addf %6, %12 : vector<128x1xf32>
    %cst_4 = arith.constant 0.000000e+00 : f32
    %14 = vector.broadcast %cst_4 : f32 to vector<128x32xf32>
    %15 = arith.select %4, %0, %14 : vector<128x32xi1>, vector<128x32xf32>
    %cst_5 = arith.constant dense<0.000000e+00> : vector<128xf32>
    %16 = vector.multi_reduction <add>, %15, %cst_5 [1] : vector<128x32xf32> to vector<128xf32>
    %17 = vector.shape_cast %16 : vector<128xf32> to vector<128x1xf32>
    %c0_i32 = arith.constant 0 : i32
    %18 = vector.broadcast %c0_i32 : i32 to vector<128x1xi32>
    %19 = arith.cmpi ne, %1, %18 : vector<128x1xi32>
    %20 = arith.extui %19 : vector<128x1xi1> to vector<128x1xi32>
    %21 = arith.sitofp %20 : vector<128x1xi32> to vector<128x1xf32>
    %22 = arith.subf %13, %17 : vector<128x1xf32>
    %23 = arith.mulf %22, %21 : vector<128x1xf32>
    %24 = vector.shape_cast %23 : vector<128x1xf32> to vector<1x128x1xf32>
    %cst_6 = arith.constant dense<0.000000e+00> : vector<1xf32>
    %25 = vector.multi_reduction <add>, %24, %cst_6 [1, 2] : vector<1x128x1xf32> to vector<1xf32>
    %26 = vector.shape_cast %25 : vector<1xf32> to vector<1x1x1xf32>
    %27 = vector.extract %26[0, 0, 0] : f32 from vector<1x1x1xf32>
    %28 = vector.shape_cast %21 : vector<128x1xf32> to vector<1x128x1xf32>
    %cst_7 = arith.constant dense<0.000000e+00> : vector<1xf32>
    %29 = vector.multi_reduction <add>, %28, %cst_7 [1, 2] : vector<1x128x1xf32> to vector<1xf32>
    %30 = vector.shape_cast %29 : vector<1xf32> to vector<1x1x1xf32>
    %31 = vector.extract %30[0, 0, 0] : f32 from vector<1x1x1xf32>
    %c0_8 = arith.constant 0 : index
    %c0_9 = arith.constant 0 : index
    %32 = vector.load %arg3[%c0_8, %c0_9] : memref<3x128xf32, #tpu.memory_space<vmem>>, vector<3x128xf32>
    %33 = vector.extract_strided_slice %32 {offsets = [0, 0], sizes = [1, 128], strides = [1, 1]} : vector<3x128xf32> to vector<1x128xf32>
    %34 = vector.extract_strided_slice %32 {offsets = [1, 0], sizes = [1, 128], strides = [1, 1]} : vector<3x128xf32> to vector<1x128xf32>
    %35 = arith.subf %33, %34 : vector<1x128xf32>
    %36 = vector.extract_strided_slice %32 {offsets = [2, 0], sizes = [1, 128], strides = [1, 1]} : vector<3x128xf32> to vector<1x128xf32>
    %37 = arith.mulf %36, %35 : vector<1x128xf32>
    %38 = arith.mulf %37, %35 : vector<1x128xf32>
    %39 = vector.shape_cast %38 : vector<1x128xf32> to vector<1x1x128xf32>
    %cst_10 = arith.constant dense<0.000000e+00> : vector<1xf32>
    %40 = vector.multi_reduction <add>, %39, %cst_10 [1, 2] : vector<1x1x128xf32> to vector<1xf32>
    %41 = vector.shape_cast %40 : vector<1xf32> to vector<1x1x1xf32>
    %42 = vector.extract %41[0, 0, 0] : f32 from vector<1x1x1xf32>
    %43 = vector.shape_cast %36 : vector<1x128xf32> to vector<1x1x128xf32>
    %cst_11 = arith.constant dense<0.000000e+00> : vector<1xf32>
    %44 = vector.multi_reduction <add>, %43, %cst_11 [1, 2] : vector<1x1x128xf32> to vector<1xf32>
    %45 = vector.shape_cast %44 : vector<1xf32> to vector<1x1x1xf32>
    %46 = vector.extract %45[0, 0, 0] : f32 from vector<1x1x1xf32>
    %47 = tpu.iota {dimensions = array<i32: 0>} : vector<8x128xi32>
    %c0_i32_12 = arith.constant 0 : i32
    %48 = vector.broadcast %c0_i32_12 : i32 to vector<8x128xi32>
    %49 = arith.cmpi eq, %47, %48 : vector<8x128xi32>
    %cst_13 = arith.constant 0.000000e+00 : f32
    %50 = vector.broadcast %27 : f32 to vector<8x128xf32>
    %51 = vector.broadcast %cst_13 : f32 to vector<8x128xf32>
    %52 = arith.select %49, %50, %51 : vector<8x128xi1>, vector<8x128xf32>
    %c1_i32 = arith.constant 1 : i32
    %53 = vector.broadcast %c1_i32 : i32 to vector<8x128xi32>
    %54 = arith.cmpi eq, %47, %53 : vector<8x128xi32>
    %55 = vector.broadcast %31 : f32 to vector<8x128xf32>
    %56 = arith.select %54, %55, %52 : vector<8x128xi1>, vector<8x128xf32>
    %c2_i32 = arith.constant 2 : i32
    %57 = vector.broadcast %c2_i32 : i32 to vector<8x128xi32>
    %58 = arith.cmpi eq, %47, %57 : vector<8x128xi32>
    %59 = vector.broadcast %42 : f32 to vector<8x128xf32>
    %60 = arith.select %58, %59, %56 : vector<8x128xi1>, vector<8x128xf32>
    %c3_i32 = arith.constant 3 : i32
    %61 = vector.broadcast %c3_i32 : i32 to vector<8x128xi32>
    %62 = arith.cmpi eq, %47, %61 : vector<8x128xi32>
    %63 = vector.broadcast %46 : f32 to vector<8x128xf32>
    %64 = arith.select %62, %63, %60 : vector<8x128xi1>, vector<8x128xf32>
    %65 = vector.shape_cast %64 : vector<8x128xf32> to vector<1x8x128xf32>
    %c0_14 = arith.constant 0 : index
    %c0_15 = arith.constant 0 : index
    %c0_16 = arith.constant 0 : index
    %66 = vector.load %arg4[%c0_14, %c0_15, %c0_16] : memref<1x8x128xf32, #tpu.memory_space<vmem>>, vector<1x8x128xf32>
    tpu.vector_store %arg4[%c0_14, %c0_15, %c0_16], %65 {strides = array<i32>} : memref<1x8x128xf32, #tpu.memory_space<vmem>>, vector<1x8x128xf32>,
    return
  }
  func.func @transform_0(%arg0: i32) -> (i32, i32) {
    %c0_i32 = arith.constant 0 : i32
    %c0_i32_0 = arith.constant 0 : i32
    return %arg0, %c0_i32 : i32, i32
  }
  func.func @transform_1(%arg0: i32) -> (i32, i32) {
    %c0_i32 = arith.constant 0 : i32
    %c0_i32_0 = arith.constant 0 : i32
    return %arg0, %c0_i32 : i32, i32
  }
  func.func @transform_2(%arg0: i32) -> (i32, i32) {
    %c0_i32 = arith.constant 0 : i32
    %c0_i32_0 = arith.constant 0 : i32
    return %c0_i32, %arg0 : i32, i32
  }
  func.func @transform_3(%arg0: i32) -> (i32, i32, i32) {
    %c0_i32 = arith.constant 0 : i32
    %c0_i32_0 = arith.constant 0 : i32
    %c0_i32_1 = arith.constant 0 : i32
    return %arg0, %c0_i32, %c0_i32_0 : i32, i32, i32
  }
}

</mosaic_0001>

<bundles_post_ra>
// kernel: dtp_loss_rb1.1
= control target key start
LH: loop header
LB: loop body
LE: loop exit
PB: predicated region body
PF: predicated region fallthrough
CT: control target
= control target key end

     0   :  { %vm112_vm0 = vcmask 261120   ;;  %v678_v3 = vmov 0   ;;  %s1184_s0 = inlined_call_operand.vmem [shape: f32[128,32], index: 0, kind: input, shape index: {}]   ;;  %s1185_s1 = inlined_call_operand.vmem [shape: s32[128,1], index: 1, kind: input, shape index: {}]   ;;  %s1186_s2 = inlined_call_operand.vmem [shape: f32[3,128], index: 2, kind: input, shape index: {}]   ;;  %s1187_s3 = inlined_call_operand.vmem [shape: f32[1,8,128], index: 3, kind: output, shape index: {}]  }
   0x1   :  { %v703_v0 = vld [vmem:[%s1184_s0 + $0x18] sm:$0xff]  ;;  %v708_v1 = vld [vmem:[%s1184_s0 + $0x8] sm:$0xff]  ;;  %v713_v2 = vld [vmem:[%s1184_s0] sm:$0xff]  ;;  %611 = vset.pattern.permute.xlu0 %v678_v3  ;;  %613 = vset.pattern.permute.xlu1 %v678_v3 }
   0x2   :  { %v122_v4 = vsel %vm112_vm0, %v703_v0, -inf  ;;  %v116_v5 = vsel %vm112_vm0, %v708_v1, -inf  ;;  %v113_v6 = vsel %vm112_vm0, %v713_v2, -inf  ;;  %612 = vset.pattern.permute.xlu2 %v678_v3  ;;  %v724_v7 = vld [vmem:[%s1184_s0 + $0x58] sm:$0xff]  ;;  %v729_v8 = vld [vmem:[%s1184_s0 + $0x10] sm:$0xff]  ;;  %v734_v9 = vld [vmem:[%s1184_s0 + $0x48] sm:$0xff] }
   0x3   :  { %123 = vmax.xlane.f32.xlu0 %v122_v4  ;;  %117 = vmax.xlane.f32.xlu2 %v116_v5  ;;  %v146_v10 = vsel %vm112_vm0, %v724_v7, -inf  ;;  %v119_v11 = vsel %vm112_vm0, %v729_v8, -inf  ;;  %v140_v12 = vsel %vm112_vm0, %v734_v9, -inf  ;;  %v745_v13 = vld [vmem:[%s1184_s0 + $0x20] sm:$0xff]  ;;  %v759_v17 = vld [vmem:[%s1184_s0 + $0x28] sm:$0xff]  ;;  %v764_v18 = vld [vmem:[%s1184_s0 + $0x70] sm:$0xff] }
   0x4   :  { %114 = vmax.xlane.f32.xlu1 %v113_v6  ;;  %v750_v14 = vld [vmem:[%s1184_s0 + $0x60] sm:$0xff]  ;;  %v125_v15 = vsel %vm112_vm0, %v745_v13, -inf  ;;  %v128_v19 = vsel %vm112_vm0, %v759_v17, -inf  ;;  %v155_v20 = vsel %vm112_vm0, %v764_v18, -inf  ;;  %v778_v22 = vld [vmem:[%s1184_s0 + $0x30] sm:$0xff]  ;;  %v783_v23 = vld [vmem:[%s1184_s0 + $0x78] sm:$0xff]  ;;  %v46_v6 = vlaneseq }
   0x5   :  { %v149_v16 = vsel %vm112_vm0, %v750_v14, -inf  ;;  %v773_v21 = vld [vmem:[%s1185_s1] sm:$0xff]  ;;  %v131_v24 = vsel %vm112_vm0, %v778_v22, -inf  ;;  %v158_v25 = vsel %vm112_vm0, %v783_v23, -inf  ;;  %v793_v26 = vld [vmem:[%s1185_s1 + $0x8] sm:$0xff]  ;;  %v798_v27 = vld [vmem:[%s1184_s0 + $0x38] sm:$0xff] }
   0x6   :  { %v134_v28 = vsel %vm112_vm0, %v798_v27, -inf  ;;  %v806_v29 = vld [vmem:[%s1185_s1 + $0x18] sm:$0xff]  ;;  %v811_v30 = vld [vmem:[%s1184_s0 + $0x40] sm:$0xff]  ;;  %v819_v32 = vld [vmem:[%s1185_s1 + $0x30] sm:$0xff] }
   0x7   :  { %v137_v31 = vsel %vm112_vm0, %v811_v30, -inf  ;;  %v824_v33 = vld [vmem:[%s1184_s0 + $0x50] sm:$0xff]  ;;  %v837_v36 = vld [vmem:[%s1185_s1 + $0x38] sm:$0xff]  ;;  %v843_v37 = vld [vmem:[%s1184_s0 + $0x68] sm:$0xff] }
   0x8   :  { %v143_v34 = vsel %vm112_vm0, %v824_v33, -inf  ;;  %v832_v35 = vld [vmem:[%s1185_s1 + $0x10] sm:$0xff]  ;;  %v152_v38 = vsel %vm112_vm0, %v843_v37, -inf  ;;  %v851_v39 = vld [vmem:[%s1185_s1 + $0x28] sm:$0xff]  ;;  %v863_v41 = vld [vmem:[%s1185_s1 + $0x58] sm:$0xff] }
   0x9   :  { %v856_v40 = vld [vmem:[%s1185_s1 + $0x48] sm:$0xff]  ;;  %v868_v42 = vld [vmem:[%s1185_s1 + $0x60] sm:$0xff]  ;;  %v875_v43 = vld [vmem:[%s1185_s1 + $0x70] sm:$0xff] }
   0xa   :  { %v880_v44 = vld [vmem:[%s1185_s1 + $0x78] sm:$0xff]  ;;  %v887_v45 = vld [vmem:[%s1185_s1 + $0x20] sm:$0xff]  ;;  %v899_v47 = vld [vmem:[%s1185_s1 + $0x50] sm:$0xff] }
   0xb   :  { %147 = vmax.xlane.f32.xlu0 %v146_v10  ;;  %120 = vmax.xlane.f32.xlu2 %v119_v11  ;;  %v893_v46 = vld [vmem:[%s1185_s1 + $0x40] sm:$0xff]  ;;  %v905_v48 = vld [vmem:[%s1185_s1 + $0x68] sm:$0xff] }
   0xc   :  { %141 = vmax.xlane.f32.xlu1 %v140_v12 }
  0x13   :  { %126 = vmax.xlane.f32.xlu2 %v125_v15  ;;  %v937_v15 = vand.u32 127, %v46_v6 }
  0x14   :  { %150 = vmax.xlane.f32.xlu1 %v149_v16 }
  0x1b   :  { %129 = vmax.xlane.f32.xlu2 %v128_v19 }
  0x1c   :  { %156 = vmax.xlane.f32.xlu1 %v155_v20 }
  0x1f   :  { %49 = vperm.xlu0 %611, %v773_v21  }
  0x23   :  { %132 = vmax.xlane.f32.xlu2 %v131_v24 }
  0x24   :  { %159 = vmax.xlane.f32.xlu1 %v158_v25 }
  0x27   :  { %52 = vperm.xlu0 %611, %v793_v26  }
  0x2b   :  { %135 = vmax.xlane.f32.xlu2 %v134_v28 }
  0x2f   :  { %58 = vperm.xlu0 %611, %v806_v29  }
  0x33   :  { %138 = vmax.xlane.f32.xlu2 %v137_v31 }
  0x37   :  { %67 = vperm.xlu0 %611, %v819_v32  }
  0x3b   :  { %144 = vmax.xlane.f32.xlu2 %v143_v34 }
  0x3d   :  { %55 = vperm.xlu1 %613, %v832_v35  }
  0x3f   :  { %70 = vperm.xlu0 %611, %v837_v36  }
  0x43   :  { %153 = vmax.xlane.f32.xlu2 %v152_v38 }
  0x45   :  { %64 = vperm.xlu1 %613, %v851_v39  }
  0x47   :  { %76 = vperm.xlu0 %611, %v856_v40  }
  0x4d   :  { %82 = vperm.xlu1 %613, %v863_v41  }
  0x4f   :  { %85 = vperm.xlu0 %611, %v868_v42  }
  0x55   :  { %91 = vperm.xlu1 %613, %v875_v43  }
  0x57   :  { %94 = vperm.xlu0 %611, %v880_v44  }
  0x5b   :  { %61 = vperm.xlu2 %612, %v887_v45  }
  0x63   :  { %73 = vperm.xlu2 %612, %v893_v46  }
  0x6b   :  { %79 = vperm.xlu2 %612, %v899_v47  }
  0x73   :  { %88 = vperm.xlu2 %612, %v905_v48  }
  0x76   :  { %v908_v49 = vpop.xlane.xlu2 %117  ;;  %v912_v52 = vpop.xlane.xlu0 %123 }
  0x77   :  { %v162_v50 = vsub.f32 %v708_v1, %v908_v49  ;;  %v916_v54 = vpop.xlane.xlu1 %114  ;;  %v164_v24 = vsub.f32 %v703_v0, %v912_v52 }
  0x78   :  { %v161_v4 = vsub.f32 %v713_v2, %v916_v54 }
  0x79   :  { %v179_v51 = vmul.f32 1.442695, %v162_v50  ;;  %v183_v34 = vmul.f32 1.442695, %v164_v24 }
  0x7a   :  { %v177_v10 = vmul.f32 1.442695, %v161_v4 }
  0x7b   :  { %614 = vpow2.f32 %v179_v51 }
  0x7e   :  { %v914_v53 = vpop.xlane.xlu2 %120  ;;  %v925_v61 = vpop.xlane.xlu0 %147 }
  0x7f   :  { %v163_v55 = vsub.f32 %v729_v8, %v914_v53  ;;  %v927_v63 = vpop.xlane.xlu1 %141 }
  0x81   :  { %v615_v56 = vpop.eup %614  ;;  %v181_v57 = vmul.f32 1.442695, %v163_v55 }
  0x82   :  { %v212_v58 = vsel %vm112_vm0, %v615_v56, 0.0 }
  0x83   :  { %616 = vpow2.f32 %v181_v57  ;;  %213 = vadd.xlane.f32.xlu1 %v212_v58 }
  0x86   :  { %v921_v59 = vpop.xlane.xlu2 %126 }
  0x87   :  { %v165_v60 = vsub.f32 %v745_v13, %v921_v59  ;;  %v943_v28 = vpop.xlane.xlu1 %150 }
  0x89   :  { %v617_v62 = vpop.eup %616  ;;  %v185_v3 = vmul.f32 1.442695, %v165_v60 }
  0x8a   :  { %v215_v5 = vsel %vm112_vm0, %v617_v62, 0.0 }
  0x8b   :  { %618 = vpow2.f32 %v185_v3  ;;  %216 = vadd.xlane.f32.xlu0 %v215_v5 }
  0x8c   :  { %620 = vpow2.f32 %v177_v10 }
  0x8e   :  { %v932_v11 = vpop.xlane.xlu2 %129 }
  0x8f   :  { %v166_v12 = vsub.f32 %v759_v17, %v932_v11 }
  0x91   :  { %v619_v16 = vpop.eup %618  ;;  %v187_v19 = vmul.f32 1.442695, %v166_v12  ;;  %v50_v20 = vpop.permute.xlu0 %49 }
  0x92   :  { %vm96_vm1 = vcmp.eq.s32.totalorder %v937_v15, %v50_v20  ;;  %v221_v25 = vsel %vm112_vm0, %v619_v16, 0.0  ;;  %v621_v50 = vpop.eup %620 }
  0x93   :  { %622 = vpow2.f32 %v187_v19  ;;  %222 = vadd.xlane.f32.xlu1 %v221_v25  ;;  %v305_v31 = vsel %vm96_vm1, %v713_v2, 0.0  ;;  %v209_v60 = vsel %vm112_vm0, %v621_v50, 0.0  ;;  %v954_v2 = vpop.xlane.xlu1 %156 }
  0x94   :  { %v321_v51 = vsel %vm112_vm0, %v305_v31, 0.0  ;;  %624 = vpow2.f32 %v183_v34  ;;  %v170_v31 = vsub.f32 %v734_v9, %v927_v63 }
  0x96   :  { %v946_v38 = vpop.xlane.xlu2 %132 }
  0x97   :  { %v167_v57 = vsub.f32 %v778_v22, %v946_v38 }
  0x99   :  { %v623_v55 = vpop.eup %622  ;;  %v53_v56 = vpop.permute.xlu0 %52  ;;  %v189_v3 = vmul.f32 1.442695, %v167_v57 }
  0x9a   :  { %vm97_vm2 = vcmp.eq.s32.totalorder %v937_v15, %v53_v56  ;;  %v224_v58 = vsel %vm112_vm0, %v623_v55, 0.0  ;;  %v625_v5 = vpop.eup %624 }
  0x9b   :  { %225 = vadd.xlane.f32.xlu0 %v224_v58  ;;  %322 = vadd.xlane.f32.xlu1 %v321_v51  ;;  %v306_v62 = vsel %vm97_vm2, %v708_v1, 0.0  ;;  %626 = vpow2.f32 %v189_v3  ;;  %v218_v16 = vsel %vm112_vm0, %v625_v5, 0.0  ;;  %v965_v24 = vpop.xlane.xlu1 %159  ;;  %v195_v51 = vmul.f32 1.442695, %v170_v31 }
  0x9c   :  { %210 = vadd.xlane.f32.xlu2 %v209_v60  ;;  %v324_v10 = vsel %vm112_vm0, %v306_v62, 0.0  ;;  %v173_v31 = vsub.f32 %v750_v14, %v943_v28  ;;  %vm370_vm2 = vcmp.ne.s32.totalorder %v793_v26, 0 }
  0x9e   :  { %v957_v4 = vpop.xlane.xlu2 %135 }
  0x9f   :  { %v168_v12 = vsub.f32 %v798_v27, %v957_v4 }
  0xa1   :  { %v191_v19 = vmul.f32 1.442695, %v168_v12  ;;  %v627_v25 = vpop.eup %626  ;;  %v59_v56 = vpop.permute.xlu0 %58 }
  0xa2   :  { %v227_v50 = vsel %vm112_vm0, %v627_v25, 0.0  ;;  %vm99_vm4 = vcmp.eq.s32.totalorder %v937_v15, %v59_v56 }
  0xa3   :  { %325 = vadd.xlane.f32.xlu0 %v324_v10  ;;  %628 = vpow2.f32 %v191_v19  ;;  %v308_v25 = vsel %vm99_vm4, %v703_v0, 0.0  ;;  %vm449_vm4 = vcmask 7168  }
  0xa4   :  { %219 = vadd.xlane.f32.xlu2 %v218_v16  ;;  %v330_v56 = vsel %vm112_vm0, %v308_v25, 0.0 }
  0xa6   :  { %v963_v20 = vpop.xlane.xlu2 %138 }
  0xa7   :  { %v169_v1 = vsub.f32 %v811_v30, %v963_v20 }
  0xa9   :  { %v193_v34 = vmul.f32 1.442695, %v169_v1  ;;  %v629_v58 = vpop.eup %628 }
  0xaa   :  { %v230_v12 = vsel %vm112_vm0, %v629_v58, 0.0  ;;  %v201_v58 = vmul.f32 1.442695, %v173_v31 }
  0xab   :  { %630 = vpow2.f32 %v193_v34  ;;  %v68_v34 = vpop.permute.xlu0 %67 }
  0xac   :  { %228 = vadd.xlane.f32.xlu2 %v227_v50  ;;  %632 = vpow2.f32 %v195_v51  ;;  %vm102_vm7 = vcmp.eq.s32.totalorder %v937_v15, %v68_v34 }
  0xad   :  { %v311_v31 = vsel %vm102_vm7, %v778_v22, 0.0  ;;  %vm374_vm7 = vcmp.ne.s32.totalorder %v851_v39, 0 }
  0xae   :  { %v972_v55 = vpop.xlane.xlu2 %144  ;;  %v339_v34 = vsel %vm112_vm0, %v311_v31, 0.0 }
  0xaf   :  { %v56_v57 = vpop.permute.xlu1 %55  ;;  %v171_v3 = vsub.f32 %v824_v33, %v972_v55 }
  0xb0   :  { %vm98_vm3 = vcmp.eq.s32.totalorder %v937_v15, %v56_v57 }
  0xb1   :  { %v631_v60 = vpop.eup %630  ;;  %v307_v62 = vsel %vm98_vm3, %v729_v8, 0.0  ;;  %v197_v16 = vmul.f32 1.442695, %v171_v3  ;;  %v172_v8 = vsub.f32 %v724_v7, %v925_v61  ;;  %vm369_vm3 = vcmp.ne.s32.totalorder %v773_v21, 0 }
  0xb2   :  { %v327_v5 = vsel %vm112_vm0, %v307_v62, 0.0  ;;  %v233_v10 = vsel %vm112_vm0, %v631_v60, 0.0  ;;  %v633_v1 = vpop.eup %632 }
  0xb3   :  { %328 = vadd.xlane.f32.xlu1 %v327_v5  ;;  %234 = vadd.xlane.f32.xlu0 %v233_v10  ;;  %634 = vpow2.f32 %v197_v16  ;;  %v236_v51 = vsel %vm112_vm0, %v633_v1, 0.0  ;;  %v199_v57 = vmul.f32 1.442695, %v172_v8  ;;  %v71_v16 = vpop.permute.xlu0 %70 }
  0xb4   :  { %231 = vadd.xlane.f32.xlu2 %v230_v12  ;;  %vm103_vm8 = vcmp.eq.s32.totalorder %v937_v15, %v71_v16 }
  0xb5   :  { %636 = vpow2.f32 %v199_v57 }
  0xb6   :  { %v982_v19 = vpop.xlane.xlu2 %153  ;;  %638 = vpow2.f32 %v201_v58 }
  0xb7   :  { %v65_v50 = vpop.permute.xlu1 %64  ;;  %v174_v10 = vsub.f32 %v843_v37, %v982_v19 }
  0xb8   :  { %vm101_vm5 = vcmp.eq.s32.totalorder %v937_v15, %v65_v50  ;;  %v176_v50 = vsub.f32 %v783_v23, %v965_v24 }
  0xb9   :  { %v310_v0 = vsel %vm101_vm5, %v759_v17, 0.0  ;;  %v635_v62 = vpop.eup %634  ;;  %v203_v8 = vmul.f32 1.442695, %v174_v10  ;;  %vm371_vm5 = vcmp.ne.s32.totalorder %v832_v35, 0 }
  0xba   :  { %v336_v12 = vsel %vm112_vm0, %v310_v0, 0.0  ;;  %v239_v1 = vsel %vm112_vm0, %v635_v62, 0.0  ;;  %v207_v22 = vmul.f32 1.442695, %v176_v50  ;;  %v312_v0 = vsel %vm103_vm8, %v798_v27, 0.0 }
  0xbb   :  { %237 = vadd.xlane.f32.xlu1 %v236_v51  ;;  %v637_v17 = vpop.eup %636  ;;  %640 = vpow2.f32 %v203_v8  ;;  %vm375_vm8 = vcmp.ne.s32.totalorder %v819_v32, 0 }
  0xbc   :  { %331 = vadd.xlane.f32.xlu2 %v330_v56  ;;  %v639_v25 = vpop.eup %638  ;;  %v242_v56 = vsel %vm112_vm0, %v637_v17, 0.0 }
  0xbd   :  { %v245_v57 = vsel %vm112_vm0, %v639_v25, 0.0 }
  0xbe   :  { %v62_v60 = vpop.permute.xlu2 %61 }
  0xbf   :  { %vm100_vm6 = vcmp.eq.s32.totalorder %v937_v15, %v62_v60  ;;  %v77_v60 = vpop.permute.xlu0 %76  ;;  %v83_v8 = vpop.permute.xlu1 %82 }
  0xc0   :  { %v309_v3 = vsel %vm100_vm6, %v745_v13, 0.0  ;;  %v175_v13 = vsub.f32 %v764_v18, %v954_v2  ;;  %vm105_vm10 = vcmp.eq.s32.totalorder %v937_v15, %v77_v60  ;;  %vm107_vm13 = vcmp.eq.s32.totalorder %v937_v15, %v83_v8 }
  0xc1   :  { %v333_v5 = vsel %vm112_vm0, %v309_v3, 0.0  ;;  %v641_v3 = vpop.eup %640  ;;  %vm373_vm6 = vcmp.ne.s32.totalorder %v887_v45, 0 }
  0xc2   :  { %334 = vadd.xlane.f32.xlu0 %v333_v5  ;;  %v205_v58 = vmul.f32 1.442695, %v175_v13  ;;  %v342_v5 = vsel %vm112_vm0, %v312_v0, 0.0 }
  0xc3   :  { %337 = vadd.xlane.f32.xlu1 %v336_v12  ;;  %v248_v12 = vsel %vm112_vm0, %v641_v3, 0.0 }
  0xc4   :  { %240 = vadd.xlane.f32.xlu2 %v239_v1  ;;  %642 = vpow2.f32 %v205_v58 }
  0xc5   :  { %644 = vpow2.f32 %v207_v22 }
  0xc6   :  { %v74_v51 = vpop.permute.xlu2 %73 }
  0xc7   :  { %vm104_vm9 = vcmp.eq.s32.totalorder %v937_v15, %v74_v51  ;;  %v86_v27 = vpop.permute.xlu0 %85  ;;  %v92_v58 = vpop.permute.xlu1 %91 }
  0xc8   :  { %v313_v62 = vsel %vm104_vm9, %v811_v30, 0.0  ;;  %v314_v30 = vsel %vm105_vm10, %v734_v9, 0.0  ;;  %vm108_vm12 = vcmp.eq.s32.totalorder %v937_v15, %v86_v27  ;;  %vm110_vm1 = vcmp.eq.s32.totalorder %v937_v15, %v92_v58 }
  0xc9   :  { %v345_v10 = vsel %vm112_vm0, %v313_v62, 0.0  ;;  %v348_v31 = vsel %vm112_vm0, %v314_v30, 0.0  ;;  %v317_v51 = vsel %vm108_vm12, %v750_v14, 0.0  ;;  %vm376_vm9 = vcmp.ne.s32.totalorder %v837_v36, 0 }
  0xca   :  { %243 = vadd.xlane.f32.xlu0 %v242_v56  ;;  %v643_v16 = vpop.eup %642  ;;  %v316_v56 = vsel %vm107_vm13, %v724_v7, 0.0  ;;  %v357_v22 = vsel %vm112_vm0, %v317_v51, 0.0  ;;  %vm377_vm10 = vcmp.ne.s32.totalorder %v893_v46, 0  ;;  %vm379_vm12 = vcmp.ne.s32.totalorder %v899_v47, 0 }
  0xcb   :  { %246 = vadd.xlane.f32.xlu1 %v245_v57  ;;  %v645_v17 = vpop.eup %644  ;;  %v251_v25 = vsel %vm112_vm0, %v643_v16, 0.0  ;;  %v354_v60 = vsel %vm112_vm0, %v316_v56, 0.0  ;;  %vm380_vm13 = vcmp.ne.s32.totalorder %v863_v41, 0  ;;  %v1120_v41 = vld [vmem:[%s1186_s2] sm:$0x7] }
  0xcc   :  { %340 = vadd.xlane.f32.xlu2 %v339_v34  ;;  %v254_v13 = vsel %vm112_vm0, %v645_v17, 0.0 }
  0xce   :  { %v80_v1 = vpop.permute.xlu2 %79 }
  0xcf   :  { %vm106_vm11 = vcmp.eq.s32.totalorder %v937_v15, %v80_v1  ;;  %v95_v57 = vpop.permute.xlu0 %94 }
  0xd0   :  { %v315_v50 = vsel %vm106_vm11, %v824_v33, 0.0  ;;  %vm111_vm15 = vcmp.eq.s32.totalorder %v937_v15, %v95_v57  ;;  %v319_v33 = vsel %vm110_vm1, %v764_v18, 0.0  ;;  %vm378_vm11 = vcmp.ne.s32.totalorder %v856_v40, 0 }
  0xd1   :  { %v351_v34 = vsel %vm112_vm0, %v315_v50, 0.0  ;;  %v320_v7 = vsel %vm111_vm15, %v783_v23, 0.0  ;;  %v363_v3 = vsel %vm112_vm0, %v319_v33, 0.0  ;;  %vm382_vm15 = vcmp.ne.s32.totalorder %v905_v48, 0 }
  0xd2   :  { %343 = vadd.xlane.f32.xlu0 %v342_v5  ;;  %v366_v62 = vsel %vm112_vm0, %v320_v7, 0.0  ;;  %vm383_vm1 = vcmp.ne.s32.totalorder %v875_v43, 0 }
  0xd3   :  { %346 = vadd.xlane.f32.xlu1 %v345_v10 }
  0xd4   :  { %249 = vadd.xlane.f32.xlu2 %v248_v12 }
  0xd6   :  { %v89_v9 = vpop.permute.xlu2 %88 }
  0xd7   :  { %vm109_vm14 = vcmp.eq.s32.totalorder %v937_v15, %v89_v9  ;;  %v679_v15 = vmov 0.0  }
  0xd8   :  { %v318_v14 = vsel %vm109_vm14, %v843_v37, 0.0  ;;  %v586_v37 = vsel %vm370_vm2, 1.0, %v679_v15  ;;  %v585_v18 = vsel %vm369_vm3, 1.0, %v679_v15  ;;  %v587_v1 = vsel %vm371_vm5, 1.0, %v679_v15 }
  0xd9   :  { %v360_v0 = vsel %vm112_vm0, %v318_v14, 0.0  ;;  %v491_v23 = vsel %vm449_vm4, %v586_v37, 0.0  ;;  %v490_v5 = vsel %vm449_vm4, %v585_v18, 0.0  ;;  %v493_v21 = vsel %vm449_vm4, %v587_v1, 0.0 }
  0xda   :  { %252 = vadd.xlane.f32.xlu0 %v251_v25  ;;  %v492_v10 = vadd.f32 %v491_v23, %v490_v5  ;;  %vm372_vm0 = vcmp.ne.s32.totalorder %v806_v29, 0  ;;  %v1055_v9 = vsel %vm373_vm6, 1.0, %v679_v15  ;;  %v1061_v39 = vsel %vm374_vm7, 1.0, %v679_v15 }
  0xdb   :  { %255 = vadd.xlane.f32.xlu1 %v254_v13  ;;  %v588_v13 = vsel %vm372_vm0, 1.0, %v679_v15  ;;  %v497_v29 = vsel %vm449_vm4, %v1055_v9, 0.0  ;;  %v499_v7 = vsel %vm449_vm4, %v1061_v39, 0.0  ;;  %v1077_v32 = vsel %vm376_vm9, 1.0, %v679_v15 }
  0xdc   :  { %349 = vadd.xlane.f32.xlu2 %v348_v31  ;;  %v494_v26 = vadd.f32 %v493_v21, %v492_v10  ;;  %v495_v51 = vsel %vm449_vm4, %v588_v13, 0.0  ;;  %v503_v36 = vsel %vm449_vm4, %v1077_v32, 0.0  ;;  %v1082_v46 = vsel %vm377_vm10, 1.0, %v679_v15 }
  0xdd   :  { %v1100_v47 = vsel %vm379_vm12, 1.0, %v679_v15  ;;  %vm381_vm14 = vcmp.ne.s32.totalorder %v868_v42, 0  ;;  %vm384_vm2 = vcmp.ne.s32.totalorder %v880_v44, 0  ;;  %vm543_vm3 = vcmask 1040384  }
  0xde   :  { %v496_v58 = vadd.f32 %v495_v51, %v494_v26  ;;  %v1146_v44 = vsel %vm384_vm2, 1.0, %v679_v15 }
  0xe2   :  { %352 = vadd.xlane.f32.xlu0 %v351_v34 }
  0xe3   :  { %358 = vadd.xlane.f32.xlu1 %v357_v22  ;;  %v498_v22 = vadd.f32 %v497_v29, %v496_v58 }
  0xe4   :  { %355 = vadd.xlane.f32.xlu2 %v354_v60 }
  0xe5   :  { %v500_v33 = vadd.f32 %v499_v7, %v498_v22 }
  0xea   :  { %361 = vadd.xlane.f32.xlu0 %v360_v0 }
  0xeb   :  { %367 = vadd.xlane.f32.xlu1 %v366_v62 }
  0xec   :  { %364 = vadd.xlane.f32.xlu2 %v363_v3 }
  0xf6   :  { %v214_v12 = vpop.xlane.xlu1 %213 }
  0xf7   :  { %646 = vlog2.f32 %v214_v12 }
  0xfd   :  { %v647_v17 = vpop.eup %646 }
  0xfe   :  { %v217_v16 = vpop.xlane.xlu0 %216  ;;  %v260_v25 = vmul.f32 0.6931472, %v647_v17 }
 0x100   :  { %v290_v35 = vadd.f32 %v260_v25, %v908_v49 }
 0x106   :  { %v223_v30 = vpop.xlane.xlu1 %222 }
 0x10e   :  { %v226_v27 = vpop.xlane.xlu0 %225  ;;  %v323_v45 = vpop.xlane.xlu1 %322 }
 0x10f   :  { %v211_v8 = vpop.xlane.xlu2 %210 }
 0x110   :  { %648 = vlog2.f32 %v211_v8 }
 0x111   :  { %650 = vlog2.f32 %v217_v16 }
 0x116   :  { %v649_v31 = vpop.eup %648  ;;  %v326_v50 = vpop.xlane.xlu0 %325 }
 0x117   :  { %v258_v56 = vmul.f32 0.6931472, %v649_v31  ;;  %v418_v57 = vsub.f32 %v290_v35, %v326_v50  ;;  %v220_v34 = vpop.xlane.xlu2 %219  ;;  %v651_v62 = vpop.eup %650 }
 0x118   :  { %v262_v12 = vmul.f32 0.6931472, %v651_v62  ;;  %652 = vlog2.f32 %v220_v34 }
 0x119   :  { %v289_v49 = vadd.f32 %v258_v56, %v916_v54  ;;  %v434_v60 = vmul.f32 %v586_v37, %v418_v57  ;;  %v1071_v37 = vsel %vm375_vm8, 1.0, %v679_v15  ;;  %654 = vlog2.f32 %v223_v30 }
 0x11a   :  { %v291_v54 = vadd.f32 %v262_v12, %v914_v53  ;;  %v501_v16 = vsel %vm449_vm4, %v1071_v37, 0.0  ;;  %656 = vlog2.f32 %v226_v27  ;;  %v505_v30 = vsel %vm449_vm4, %v1082_v46, 0.0 }
 0x11b   :  { %v417_v14 = vsub.f32 %v289_v49, %v323_v45  ;;  %v451_v3 = vsel %vm449_vm4, %v434_v60, 0.0  ;;  %v502_v8 = vadd.f32 %v501_v16, %v500_v33 }
 0x11d   :  { %v433_v0 = vmul.f32 %v585_v18, %v417_v14  ;;  %v504_v25 = vadd.f32 %v503_v36, %v502_v8 }
 0x11e   :  { %v653_v21 = vpop.eup %652 }
 0x11f   :  { %v450_v23 = vsel %vm449_vm4, %v433_v0, 0.0  ;;  %v229_v5 = vpop.xlane.xlu2 %228  ;;  %v264_v35 = vmul.f32 0.6931472, %v653_v21  ;;  %v506_v51 = vadd.f32 %v505_v30, %v504_v25  ;;  %v655_v56 = vpop.eup %654  ;;  %v1110_v21 = vsel %vm380_vm13, 1.0, %v679_v15 }
 0x120   :  { %v452_v10 = vadd.f32 %v451_v3, %v450_v23  ;;  %v657_v34 = vpop.eup %656  ;;  %658 = vlog2.f32 %v229_v5  ;;  %v532_v30 = vrot.slane %v1120_v41, 1 }
 0x121   :  { %v292_v58 = vadd.f32 %v264_v35, %v912_v52  ;;  %v268_v49 = vmul.f32 0.6931472, %v657_v34  ;;  %v1094_v52 = vsel %vm378_vm11, 1.0, %v679_v15 }
 0x122   :  { %v507_v40 = vsel %vm449_vm4, %v1094_v52, 0.0  ;;  %v534_v34 = vsub.f32 %v1120_v41, %v532_v30 }
 0x123   :  { %v294_v0 = vadd.f32 %v268_v49, %v932_v11  ;;  %v508_v5 = vadd.f32 %v507_v40, %v506_v51  ;;  %v509_v11 = vsel %vm449_vm4, %v1100_v47, 0.0 }
 0x124   :  { %v536_v49 = vrot.slane %v534_v34, 6 }
 0x126   :  { %v329_v18 = vpop.xlane.xlu1 %328  ;;  %v235_v57 = vpop.xlane.xlu0 %234 }
 0x127   :  { %v419_v26 = vsub.f32 %v291_v54, %v329_v18  ;;  %v232_v17 = vpop.xlane.xlu2 %231  ;;  %v510_v54 = vadd.f32 %v509_v11, %v508_v5 }
 0x128   :  { %660 = vlog2.f32 %v232_v17  ;;  %v511_v17 = vsel %vm449_vm4, %v1110_v21, 0.0 }
 0x129   :  { %v435_v53 = vmul.f32 %v587_v1, %v419_v26  ;;  %v266_v1 = vmul.f32 0.6931472, %v655_v56  ;;  %662 = vlog2.f32 %v235_v57  ;;  %v1131_v57 = vsel %vm382_vm15, 1.0, %v679_v15 }
 0x12b   :  { %v453_v31 = vsel %vm449_vm4, %v435_v53, 0.0  ;;  %v293_v14 = vadd.f32 %v266_v1, %v921_v59 }
 0x12c   :  { %v454_v50 = vadd.f32 %v453_v31, %v452_v10  ;;  %v1124_v31 = vsel %vm381_vm14, 1.0, %v679_v15 }
 0x12d   :  { %v513_v48 = vsel %vm449_vm4, %v1124_v31, 0.0 }
 0x12e   :  { %v238_v27 = vpop.xlane.xlu1 %237 }
 0x12f   :  { %v332_v29 = vpop.xlane.xlu2 %331  ;;  %664 = vlog2.f32 %v238_v27 }
 0x130   :  { %v420_v45 = vsub.f32 %v292_v58, %v332_v29  ;;  %v515_v58 = vsel %vm449_vm4, %v1131_v57, 0.0  ;;  %v1139_v29 = vsel %vm383_vm1, 1.0, %v679_v15 }
 0x132   :  { %v436_v22 = vmul.f32 %v588_v13, %v420_v45  ;;  %v659_v13 = vpop.eup %658  ;;  %v517_v45 = vsel %vm449_vm4, %v1139_v29, 0.0 }
 0x133   :  { %v270_v18 = vmul.f32 0.6931472, %v659_v13  ;;  %v661_v36 = vpop.eup %660 }
 0x134   :  { %v455_v60 = vsel %vm449_vm4, %v436_v22, 0.0  ;;  %v663_v25 = vpop.eup %662  ;;  %v272_v51 = vmul.f32 0.6931472, %v661_v36 }
 0x135   :  { %v456_v7 = vadd.f32 %v455_v60, %v454_v50  ;;  %v335_v33 = vpop.xlane.xlu0 %334  ;;  %v295_v42 = vadd.f32 %v270_v18, %v946_v38  ;;  %v274_v38 = vmul.f32 0.6931472, %v663_v25  ;;  %v665_v13 = vpop.eup %664 }
 0x136   :  { %v421_v62 = vsub.f32 %v293_v14, %v335_v33  ;;  %v338_v3 = vpop.xlane.xlu1 %337  ;;  %v296_v60 = vadd.f32 %v272_v51, %v957_v4  ;;  %v519_v33 = vsel %vm449_vm4, %v1146_v44, 0.0 }
 0x137   :  { %v422_v59 = vsub.f32 %v294_v0, %v338_v3  ;;  %v241_v23 = vpop.xlane.xlu2 %240  ;;  %v538_v0 = vmul.f32 %v536_v49, %v1120_v41 }
 0x138   :  { %v437_v10 = vmul.f32 %v1055_v9, %v421_v62  ;;  %v512_v9 = vadd.f32 %v511_v17, %v510_v54  ;;  %666 = vlog2.f32 %v241_v23 }
 0x139   :  { %v438_v12 = vmul.f32 %v1061_v39, %v422_v59  ;;  %v539_v5 = vmul.f32 %v538_v0, %v536_v49 }
 0x13a   :  { %v457_v16 = vsel %vm449_vm4, %v437_v10, 0.0  ;;  %v514_v1 = vadd.f32 %v513_v48, %v512_v9 }
 0x13b   :  { %v458_v26 = vadd.f32 %v457_v16, %v456_v7  ;;  %v459_v8 = vsel %vm449_vm4, %v438_v12, 0.0  ;;  %v541_v10 = vrot.slane %v539_v5, 2  ;;  %v276_v12 = vmul.f32 0.6931472, %v665_v13 }
 0x13c   :  { %v516_v27 = vadd.f32 %v515_v58, %v514_v1 }
 0x13d   :  { %v460_v39 = vadd.f32 %v459_v8, %v458_v26  ;;  %v244_v53 = vpop.xlane.xlu0 %243  ;;  %v544_v16 = vsel %vm543_vm3, %v541_v10, 0.0  ;;  %v298_v36 = vadd.f32 %v276_v12, %v927_v63 }
 0x13e   :  { %v247_v35 = vpop.xlane.xlu1 %246  ;;  %v518_v40 = vadd.f32 %v517_v45, %v516_v27  ;;  %545 = vadd.xlane.f32.xlu1 %v544_v16  ;;  %v667_v26 = vpop.eup %666 }
 0x13f   :  { %v341_v50 = vpop.xlane.xlu2 %340  ;;  %668 = vlog2.f32 %v247_v35 }
 0x140   :  { %v423_v56 = vsub.f32 %v295_v42, %v341_v50  ;;  %v520_v11 = vadd.f32 %v519_v33, %v518_v40  ;;  %670 = vlog2.f32 %v244_v53  ;;  %v278_v53 = vmul.f32 0.6931472, %v667_v26 }
 0x142   :  { %v439_v43 = vmul.f32 %v1071_v37, %v423_v56  ;;  %v297_v37 = vadd.f32 %v274_v38, %v963_v20  ;;  %521 = vadd.xlane.f32.xlu2 %v520_v11  ;;  %v299_v48 = vadd.f32 %v278_v53, %v972_v55 }
 0x144   :  { %v461_v22 = vsel %vm449_vm4, %v439_v43, 0.0 }
 0x145   :  { %v462_v14 = vadd.f32 %v461_v22, %v460_v39  ;;  %v344_v7 = vpop.xlane.xlu0 %343 }
 0x146   :  { %v424_v62 = vsub.f32 %v296_v60, %v344_v7  ;;  %v347_v3 = vpop.xlane.xlu1 %346 }
 0x147   :  { %v425_v59 = vsub.f32 %v297_v37, %v347_v3  ;;  %v250_v4 = vpop.xlane.xlu2 %249 }
 0x148   :  { %v440_v15 = vmul.f32 %v1077_v32, %v424_v62  ;;  %v669_v32 = vpop.eup %668  ;;  %672 = vlog2.f32 %v250_v4 }
 0x149   :  { %v441_v20 = vmul.f32 %v1082_v46, %v425_v59  ;;  %v671_v46 = vpop.eup %670  ;;  %v282_v35 = vmul.f32 0.6931472, %v669_v32 }
 0x14a   :  { %v463_v54 = vsel %vm449_vm4, %v440_v15, 0.0  ;;  %v280_v42 = vmul.f32 0.6931472, %v671_v46 }
 0x14b   :  { %v464_v18 = vadd.f32 %v463_v54, %v462_v14  ;;  %v465_v23 = vsel %vm449_vm4, %v441_v20, 0.0  ;;  %v301_v63 = vadd.f32 %v282_v35, %v943_v28 }
 0x14c   :  { %v300_v1 = vadd.f32 %v280_v42, %v925_v61 }
 0x14d   :  { %v466_v17 = vadd.f32 %v465_v23, %v464_v18  ;;  %v253_v8 = vpop.xlane.xlu0 %252 }
 0x14e   :  { %v256_v9 = vpop.xlane.xlu1 %255  ;;  %v673_v51 = vpop.eup %672 }
 0x14f   :  { %v350_v39 = vpop.xlane.xlu2 %349  ;;  %674 = vlog2.f32 %v256_v9  ;;  %v284_v60 = vmul.f32 0.6931472, %v673_v51 }
 0x150   :  { %v426_v25 = vsub.f32 %v298_v36, %v350_v39  ;;  %676 = vlog2.f32 %v253_v8 }
 0x151   :  { %v302_v61 = vadd.f32 %v284_v60, %v982_v19 }
 0x152   :  { %v442_v30 = vmul.f32 %v1094_v52, %v426_v25 }
 0x154   :  { %v467_v50 = vsel %vm449_vm4, %v442_v30, 0.0 }
 0x155   :  { %v468_v56 = vadd.f32 %v467_v50, %v466_v17  ;;  %v353_v34 = vpop.xlane.xlu0 %352  ;;  %v675_v38 = vpop.eup %674 }
 0x156   :  { %v427_v58 = vsub.f32 %v299_v48, %v353_v34  ;;  %v359_v43 = vpop.xlane.xlu1 %358  ;;  %v677_v45 = vpop.eup %676  ;;  %v288_v14 = vmul.f32 0.6931472, %v675_v38 }
 0x157   :  { %v429_v49 = vsub.f32 %v301_v63, %v359_v43  ;;  %v356_v22 = vpop.xlane.xlu2 %355  ;;  %v286_v7 = vmul.f32 0.6931472, %v677_v45 }
 0x158   :  { %v443_v52 = vmul.f32 %v1100_v47, %v427_v58  ;;  %v428_v27 = vsub.f32 %v300_v1, %v356_v22  ;;  %v304_v40 = vadd.f32 %v288_v14, %v965_v24 }
 0x159   :  { %v445_v37 = vmul.f32 %v1124_v31, %v429_v49  ;;  %v303_v4 = vadd.f32 %v286_v7, %v954_v2  ;;  %v554_v2 = vrot.slane %v1120_v41, 2  ;;  %v567_v49 = vshrl.u32 %v46_v6, 7 }
 0x15a   :  { %v469_v55 = vsel %vm449_vm4, %v443_v52, 0.0  ;;  %v444_v28 = vmul.f32 %v1110_v21, %v428_v27 }
 0x15b   :  { %v470_v33 = vadd.f32 %v469_v55, %v468_v56  ;;  %v473_v47 = vsel %vm449_vm4, %v445_v37, 0.0  ;;  %v556_v23 = vsel %vm543_vm3, %v554_v2, 0.0  ;;  %vm571_vm5 = vcmp.eq.s32.totalorder %v567_v49, 1 }
 0x15c   :  { %v471_v0 = vsel %vm449_vm4, %v444_v28, 0.0  ;;  %vm574_vm0 = vcmp.eq.s32.totalorder %v567_v49, 2  ;;  %vm577_vm6 = vcmp.eq.s32.totalorder %v567_v49, 3 }
 0x15d   :  { %v472_v62 = vadd.f32 %v471_v0, %v470_v33  ;;  %v362_v3 = vpop.xlane.xlu0 %361 }
 0x15e   :  { %v430_v13 = vsub.f32 %v302_v61, %v362_v3  ;;  %v368_v59 = vpop.xlane.xlu1 %367 }
 0x15f   :  { %v432_v5 = vsub.f32 %v304_v40, %v368_v59  ;;  %v365_v15 = vpop.xlane.xlu2 %364  ;;  %v474_v31 = vadd.f32 %v473_v47, %v472_v62 }
 0x160   :  { %v446_v21 = vmul.f32 %v1131_v57, %v430_v13  ;;  %v431_v11 = vsub.f32 %v303_v4, %v365_v15 }
 0x161   :  { %v448_v19 = vmul.f32 %v1146_v44, %v432_v5 }
 0x162   :  { %v475_v20 = vsel %vm449_vm4, %v446_v21, 0.0  ;;  %v447_v10 = vmul.f32 %v1139_v29, %v431_v11 }
 0x163   :  { %v476_v12 = vadd.f32 %v475_v20, %v474_v31  ;;  %v479_v18 = vsel %vm449_vm4, %v448_v19, 0.0 }
 0x164   :  { %v477_v24 = vsel %vm449_vm4, %v447_v10, 0.0  ;;  %vm568_vm4 = vcmp.eq.s32.totalorder %v567_v49, 0 }
 0x165   :  { %v478_v54 = vadd.f32 %v477_v24, %v476_v12 }
 0x167   :  { %v480_v16 = vadd.f32 %v479_v18, %v478_v54 }
 0x169   :  { %481 = vadd.xlane.f32.xlu0 %v480_v16 }
 0x171   :  { %557 = vadd.xlane.f32.xlu0 %v556_v23 }
 0x1b1   :  { %v546_v26 = vpop.xlane.xlu1 %545 }
 0x1b2   :  { %v547_v8 = vrot.slane %v546_v26, 4 }
 0x1b4   :  { %v548_v32 = vadd.f32 %v547_v8, %v546_v26 }
 0x1b5   :  { %v522_v57 = vpop.xlane.xlu2 %521 }
 0x1b6   :  { %v523_v17 = vrot.slane %v522_v57, 4  ;;  %v549_v9 = vrot.slane %v548_v32, 2 }
 0x1b8   :  { %v524_v44 = vadd.f32 %v523_v17, %v522_v57  ;;  %v550_v25 = vadd.f32 %v549_v9, %v548_v32 }
 0x1ba   :  { %v525_v29 = vrot.slane %v524_v44, 2  ;;  %v551_v41 = vrot.slane %v550_v25, 1 }
 0x1bc   :  { %v526_v39 = vadd.f32 %v525_v29, %v524_v44  ;;  %v552_v38 = vadd.f32 %v551_v41, %v550_v25 }
 0x1be   :  { %v527_v42 = vrot.slane %v526_v39, 1 }
 0x1c0   :  { %v528_v56 = vadd.f32 %v527_v42, %v526_v39 }
 0x1dc   :  { %v482_v36 = vpop.xlane.xlu0 %481 }
 0x1dd   :  { %v483_v46 = vrot.slane %v482_v36, 4 }
 0x1df   :  { %v484_v53 = vadd.f32 %v483_v46, %v482_v36 }
 0x1e1   :  { %v485_v35 = vrot.slane %v484_v53, 2 }
 0x1e3   :  { %v486_v30 = vadd.f32 %v485_v35, %v484_v53 }
 0x1e4   :  { %v558_v50 = vpop.xlane.xlu0 %557 }
 0x1e5   :  { %v559_v48 = vrot.slane %v558_v50, 4  ;;  %v487_v51 = vrot.slane %v486_v30, 1 }
 0x1e7   :  { %v560_v34 = vadd.f32 %v559_v48, %v558_v50  ;;  %v488_v63 = vadd.f32 %v487_v51, %v486_v30 }
 0x1e9   :  { %v561_v58 = vrot.slane %v560_v34, 2  ;;  %601 = vpush %v488_v63 }
 0x1ea   :  { %603 = vpush %v528_v56 }
 0x1eb   :  { %v562_v43 = vadd.f32 %v561_v58, %v560_v34  ;;  %605 = vpush %v552_v38 }
 0x1ed   :  { %v563_v1 = vrot.slane %v562_v43, 1 }
 0x1ef   :  { %v564_v45 = vadd.f32 %v563_v1, %v562_v43 }
 0x1f1   :  { %607 = vpush %v564_v45 }
 0x21a   :  { %s602_s2 = spop %601 }
 0x21b   :  { %v569_v22 = vstv %s602_s2  ;;  %s604_s22 = spop %603 }
 0x21c   :  { %v570_v60 = vsel %vm568_vm4, %v569_v22, 0.0  ;;  %v572_v52 = vstv %s604_s22  ;;  %s606_s23 = spop %605 }
 0x21d   :  { %v573_v27 = vsel %vm571_vm5, %v572_v52, %v570_v60  ;;  %v575_v14 = vstv %s606_s23 }
 0x21e   :  { %v576_v7 = vsel %vm574_vm0, %v575_v14, %v573_v27 }
 0x222   :  { %s608_s24 = spop %607 }
 0x223   :  { %v578_v55 = vstv %s608_s24 }
 0x224   :  { %v579_v37 = vsel %vm577_vm6, %v578_v55, %v576_v7 }
 0x225   :  { %580 = vst [vmem:[%s1187_s3] sm:$0xff] %v579_v37 }

</bundles_post_ra>
